<compile_context>
chip_gen: v6e
topology: v6e:2x2x1
jax: 0.10.0
libtpu: 0.0.40
codegen_flags: <defaults>
</compile_context>

<pallas_src>
import jax
import jax.numpy as jnp
from jax.experimental import pallas as pl
from jax.experimental.pallas import tpu as pltpu


def gaussian(r):
    # default radial basis function: phi(r) = exp(-r^2)   (pure-JAX reference only)
    return jnp.exp(-(r * r))


def _round_up(a, m):
    return ((a + m - 1) // m) * m


def _choose_tiles(n, k, o, tm_pref, to_pref, vmem_budget):
    """Pick (tm, to, o_pad) so the double-buffered working set fits the budget."""

    def need(tm_, to_):
        # double-buffered x tile + A tile + out tile, all f32
        return 2 * (tm_ * k + k * to_ + tm_ * to_) * 4

    tm = min(tm_pref, _round_up(n, 8))
    o_min = _round_up(max(o, 128), 128)

    # Preferred layout: a single O tile so the prescaled-centers matrix stays
    # resident across the whole batch sweep and x is read from HBM exactly once.
    if need(tm, o_min) <= vmem_budget:
        return tm, o_min, o_min

    # Otherwise shrink the O tile first (stay lane-dense, multiples of 128)...
    to = max(128, min(to_pref, o_min) - (min(to_pref, o_min) % 128))
    while to > 128 and need(tm, to) > vmem_budget:
        to -= 128
    # ...then the batch tile (keep the MXU M-dim fed as long as possible).
    while tm > 8 and need(tm, to) > vmem_budget:
        tm = _round_up(tm // 2, 8)
    # Pad O up to a multiple of `to` instead of collapsing `to` to a divisor:
    # a few wasted lane-dense columns are cheaper than 4x more grid steps.
    o_pad = _round_up(o_min, to)
    return tm, to, o_pad


def rbf_gaussian_kernel(x_ref, a_ref, o_ref):
    # x_ref: (tm, K)  augmented inputs  [x, ||x||^2, 1]
    # a_ref: (K, to)  augmented prescaled centers [2*iss*c^T ; -iss ; -||c||^2*iss]
    # o_ref: (tm, to) gaussian RBF activations
    e = jnp.dot(x_ref[...], a_ref[...], preferred_element_type=jnp.float32)
    # e == -||x-c||^2 * iss ; clamp tiny positive cancellation error to exp(0)=1.
    o_ref[...] = jnp.exp(jnp.minimum(e, 0.0))


def rbf_forward(x, centers, log_sigmas, *, tm=512, to_pref=1024,
                vmem_budget_bytes=44 * (1 << 20)):
    """Gaussian RBF forward. x: (N, F), centers: (O, F), log_sigmas: (O,) -> (N, O) f32."""
    x = x.astype(jnp.float32)
    centers = centers.astype(jnp.float32)
    log_sigmas = log_sigmas.astype(jnp.float32)

    N, F = x.shape
    O = centers.shape[0]
    K = F + 2  # contraction dim: F features + x^2 column + constant-1 column

    tm_eff, to, O_pad = _choose_tiles(N, K, O, tm, to_pref, vmem_budget_bytes)

    # ---- one-time wrapper precompute (small params; single fused pass) ----
    if O_pad != O:
        # zero centers / log_sigmas=0 padding is inert: padded columns give
        # e = -||x||^2 <= 0 (finite) and are sliced off below.
        centers = jnp.pad(centers, ((0, O_pad - O), (0, 0)))
        log_sigmas = jnp.pad(log_sigmas, (0, O_pad - O))
    iss = jnp.exp(-2.0 * log_sigmas)                                    # (O_pad,)
    a = jnp.concatenate(
        [(centers * (2.0 * iss)[:, None]).T,                            # (F, O_pad)
         (-iss)[None, :],                                               # pairs with x^2
         (-(jnp.sum(centers * centers, axis=1) * iss))[None, :]],       # pairs with 1
        axis=0)                                                         # (K, O_pad)

    # Augmented inputs: one fused concat pass over x. N itself is NOT padded;
    # the ragged last batch tile is handled by the cdiv grid below.
    x_sq = jnp.sum(x * x, axis=-1, keepdims=True)                       # (N, 1)
    x_aug = jnp.concatenate([x, x_sq, jnp.ones_like(x_sq)], axis=-1)    # (N, K)

    n_tiles = pl.cdiv(N, tm_eff)
    o_tiles = O_pad // to
    grid = (n_tiles, o_tiles)   # long N axis leads -> v7x megacore split uses it

    need_bytes = 2 * (tm_eff * K + K * to + tm_eff * to) * 4
    vmem_limit = int(max(need_bytes + (4 << 20), 32 << 20))

    out = pl.pallas_call(
        rbf_gaussian_kernel,
        out_shape=jax.ShapeDtypeStruct((N, O_pad), jnp.float32),
        grid_spec=pltpu.PrefetchScalarGridSpec(
            num_scalar_prefetch=0,
            grid=grid,
            in_specs=[
                pl.BlockSpec((tm_eff, K), lambda i, j: (i, 0)),  # x tile (resident over j)
                pl.BlockSpec((K, to), lambda i, j: (0, j)),      # augmented centers tile
            ],
            out_specs=pl.BlockSpec((tm_eff, to), lambda i, j: (i, j)),
        ),
        compiler_params=pltpu.CompilerParams(
            dimension_semantics=("parallel", "parallel"),
            vmem_limit_bytes=vmem_limit,
        ),
        cost_estimate=pl.CostEstimate(
            flops=2 * N * O_pad * K,
            transcendentals=N * O_pad,
            bytes_accessed=4 * (N * K + K * O_pad + N * O_pad),
        ),
    )(x_aug, a)

    return out[:, :O]


# TODO(synk): only the gaussian basis_func is specialized; other torch_rbf basis
# functions (linear, multiquadric, ...) need the explicit r = sqrt(d2)/sigma path.
# TODO(synk): for very large in_features (F >~ 4k) add a K grid axis with a VMEM
# accumulator instead of relying on the VMEM budget shrinking tm/to.


if __name__ == "__main__":
    # Module config (in_features, out_features) + synthetic deterministic params.
    N, in_features, out_features = 16, 32, 16

    key = jax.random.PRNGKey(0)
    k_x, k_c = jax.random.split(key)
    x = jax.random.normal(k_x, (N, in_features), dtype=jnp.float32)
    # reset_parameters(): centers ~ N(0, 1), log_sigmas = 0
    centers = jax.random.normal(k_c, (out_features, in_features), dtype=jnp.float32)
    log_sigmas = jnp.zeros((out_features,), dtype=jnp.float32)

    out = jax.block_until_ready(rbf_forward(x, centers, log_sigmas))

    # Pure-JAX reference (mirrors the PyTorch broadcast formulation exactly).
    diff = x[:, None, :] - centers[None, :, :]
    dist = jnp.sqrt(jnp.sum(diff * diff, axis=-1)) / jnp.exp(log_sigmas)[None, :]
    ref = gaussian(dist)

    assert out.shape == (N, out_features)
    assert jnp.allclose(out, ref, atol=5e-5, rtol=1e-4), "mismatch vs reference"
    print("KERNEL_OK")
</pallas_src>

<mosaic_0001>
module attributes {stable_mosaic.version = 11 : i64} {
  func.func @rbf_gaussian_kernel(%arg0: i32, %arg1: i32, %arg2: memref<16x34xf32, #tpu.memory_space<vmem>>, %arg3: memref<34x128xf32, #tpu.memory_space<vmem>>, %arg4: memref<16x128xf32, #tpu.memory_space<vmem>>) attributes {dimension_semantics = [#tpu.dimension_semantics<parallel>, #tpu.dimension_semantics<parallel>], iteration_bounds = array<i64: 1, 1>, scalar_prefetch = 0 : i64, scratch_operands = 0 : i64, tpu.core_type = #tpu.core_type<tc>, window_params = [{transform_indices = @transform_0, window_bounds = array<i64: 16, 34>}, {transform_indices = @transform_1, window_bounds = array<i64: 34, 128>}, {transform_indices = @transform_2, window_bounds = array<i64: 16, 128>}]} {
    %c0 = arith.constant 0 : index
    %c0_0 = arith.constant 0 : index
    %0 = vector.load %arg2[%c0, %c0_0] : memref<16x34xf32, #tpu.memory_space<vmem>>, vector<16x34xf32>
    %c0_1 = arith.constant 0 : index
    %c0_2 = arith.constant 0 : index
    %1 = vector.load %arg3[%c0_1, %c0_2] : memref<34x128xf32, #tpu.memory_space<vmem>>, vector<34x128xf32>
    %cst = arith.constant dense<0.000000e+00> : vector<16x128xf32>
    %2 = tpu.matmul %0, %1, %cst {dimension_numbers = #tpu.dot_dimension_numbers<[1], [0], [0], [1], [0, 0, 1, 1], [], []>} : vector<16x34xf32>, vector<34x128xf32>, vector<16x128xf32> -> vector<16x128xf32>
    %cst_3 = arith.constant 0.000000e+00 : f32
    %3 = vector.broadcast %cst_3 : f32 to vector<16x128xf32>
    %4 = arith.minimumf %2, %3 : vector<16x128xf32>
    %5 = math.exp %4 : vector<16x128xf32>
    %c0_4 = arith.constant 0 : index
    %c0_5 = arith.constant 0 : index
    %6 = vector.load %arg4[%c0_4, %c0_5] : memref<16x128xf32, #tpu.memory_space<vmem>>, vector<16x128xf32>
    tpu.vector_store %arg4[%c0_4, %c0_5], %5 {strides = array<i32>} : memref<16x128xf32, #tpu.memory_space<vmem>>, vector<16x128xf32>,
    return
  }
  func.func @transform_0(%arg0: i32, %arg1: i32) -> (i32, i32) {
    %c0_i32 = arith.constant 0 : i32
    %c0_i32_0 = arith.constant 0 : i32
    return %arg0, %c0_i32 : i32, i32
  }
  func.func @transform_1(%arg0: i32, %arg1: i32) -> (i32, i32) {
    %c0_i32 = arith.constant 0 : i32
    %c0_i32_0 = arith.constant 0 : i32
    return %c0_i32, %arg1 : i32, i32
  }
  func.func @transform_2(%arg0: i32, %arg1: i32) -> (i32, i32) {
    %c0_i32 = arith.constant 0 : i32
    return %arg0, %arg1 : i32, i32
  }
}

</mosaic_0001>

<bundles_post_ra>
// kernel: tpu_custom_call.1
= control target key start
LH: loop header
LB: loop body
LE: loop exit
PB: predicated region body
PF: predicated region fallthrough
CT: control target
= control target key end

     0   :  { %7 = vsyncpa [#allocation3], 0  ;;  %s297_s0 = inlined_call_operand.hbm [shape: f32[16,34], index: 0, kind: input, shape index: {}]   ;;  %s298_s1 = inlined_call_operand.hbm [shape: f32[34,128], index: 1, kind: input, shape index: {}]   ;;  %s299_s2 = inlined_call_operand.hbm [shape: f32[16,128], index: 2, kind: output, shape index: {}]  }
   0x1   :  { %8 = vsyncpa [#allocation6], 0 }
   0x2   :  { %9 = vsyncpa [#allocation4], 0  ;;  %s257_s9 = smov [#allocation2]  }
   0x3   :  { %s15_s10 = sshll.u32 %s257_s9, 4  ;;  %s16_s10 = int_to_ptr.vmem [resolvable:$true] %s15_s10 }
   0x4   :  { %s199_s11 = scalar_lea.vmem %s16_s10, 256  ;;  %p204_p1 = scmp.lt.s32.totalorder %s16_s10, %s16_s10 }
   0x5   :  { %p200_p0 = scmp.ne.s32.totalorder %s16_s10, %s199_s11  ;;  %p205_p2 = scmp.lt.s32.totalorder %s199_s11, %s199_s11 }
   0x7   :  { %p206_p3 = por %p205_p2, %p204_p1 }
   0x9   :  { %p207_p4 = pnand %p206_p3, %p200_p0 }
   0xb   :  { %210 = shalt.err (!%p207_p4)
}
   0xc   :  { %s258_s12 = smov 128   ;;  %s259_s13 = smov 8  }
   0xd   :  { %21 = dma.hbm_to_vmem [thread:$0]  %s297_s0, 256, %s16_s10, [#allocation3], %s258_s12, %s258_s12, %s259_s13  }
   0xe   :  { %s260_s16 = smov [#allocation5]  }
   0xf   :  { %s27_s17 = sshll.u32 %s260_s16, 4  ;;  %s28_s17 = int_to_ptr.vmem [resolvable:$true] %s27_s17 }
  0x10   :  { %s219_s18 = scalar_lea.vmem %s28_s17, 640  ;;  %p224_p6 = scmp.lt.s32.totalorder %s28_s17, %s28_s17 }
  0x11   :  { %p220_p5 = scmp.ne.s32.totalorder %s28_s17, %s219_s18  ;;  %p225_p7 = scmp.lt.s32.totalorder %s219_s18, %s219_s18 }
  0x13   :  { %p226_p8 = por %p225_p7, %p224_p6 }
  0x15   :  { %p227_p9 = pnand %p226_p8, %p220_p5 }
  0x17   :  { %230 = shalt.err (!%p227_p9)
}
  0x18   :  { %33 = dma.hbm_to_vmem [thread:$0]  %s298_s1, 640, %s28_s17, [#allocation6], %s258_s12, %s258_s12, %s259_s13  }
  0x19   :  { %251 = dma.done.wait [#allocation3], 256  }
  0x1a   :  { %252 = vsyncadd [#allocation3], 4294967040 }
  0x1b   :  { %253 = dma.done.wait [#allocation6], 640  }
  0x1c   :  { %254 = vsyncadd [#allocation6], 4294966656  ;;  %vm54_vm0 = vcmask 1041408   ;;  %vm47_vm1 = vcmask 277504   ;;  %v46_v0 = vld [vmem:[#allocation5 + $0x20] sm:$0x3] }
  0x1d   :  { %v45_v1 = vld [vmem:[#allocation5 + $0x18] sm:$0xff]  ;;  %169 = vmatprep.subr.msk.mxu0 %vm54_vm0, %v46_v0  ;;  %v40_v2 = vld [vmem:[#allocation2] sm:$0xff]  ;;  %v43_v4 = vld [vmem:[#allocation5 + $0x8] sm:$0xff]  ;;  %s261_s0 = smov [#allocation7]  }
  0x1e   :  { %170 = vmatpush3.msk.msra.mxu0 %vm54_vm0, %v46_v0  ;;  %v44_v3 = vld [vmem:[#allocation5 + $0x10] sm:$0xff]  ;;  %179 = vmatprep.mubr.msk.f32.mxu0 %vm47_vm1, %v40_v2  ;;  %v42_v5 = vld [vmem:[#allocation5] sm:$0xff]  ;;  %v41_v6 = vld [vmem:[#allocation2 + $0x8] sm:$0xff]  ;;  %s146_s1 = sshll.u32 %s261_s0, 4  ;;  %s147_s1 = int_to_ptr.vmem [resolvable:$true] %s146_s1 }
  0x1f   :  { %171 = vmatprep.subr.mxu0 %v45_v1  ;;  %s231_s21 = scalar_lea.vmem %s147_s1, 256  ;;  %p236_p11 = scmp.lt.s32.totalorder %s147_s1, %s147_s1 }
  0x20   :  { %172 = vmatpush3.msra.mxu0 %v45_v1  ;;  %p232_p10 = scmp.ne.s32.totalorder %s147_s1, %s231_s21  ;;  %p237_p12 = scmp.lt.s32.totalorder %s231_s21, %s231_s21 }
  0x21   :  { %173 = vmatprep.subr.mxu0 %v44_v3 }
  0x22   :  { %174 = vmatpush3.msra.mxu0 %v44_v3  ;;  %p238_p13 = por %p237_p12, %p236_p11 }
  0x23   :  { %175 = vmatprep.subr.mxu0 %v43_v4 }
  0x24   :  { %176 = vmatpush3.msra.mxu0 %v43_v4  ;;  %p239_p0 = pnand %p238_p13, %p232_p10 }
  0x25   :  { %177 = vmatprep.subr.mxu0 %v42_v5 }
  0x26   :  { %178 = vmatpush3.msra.mxu0 %v42_v5 }
  0x27   :  { %180 = vmatmul.mubr.msk.f32.vlgmr.msra.gmra.mxu0 %vm47_vm1, %v41_v6 }
  0xe7   :  { %v181_v7 = vpop.f32.mrf.mxu0 }
  0xe8   :  { %v134_v8 = vmin.f32 %v181_v7, 0.0 }
  0xe9   :  { %v124_v9 = vpop.f32.mrf.mxu0 }
  0xea   :  { %v137_v10 = vmul.f32 1.442695, %v134_v8  ;;  %v133_v11 = vmin.f32 %v124_v9, 0.0 }
  0xec   :  { %187 = vpow2.f32 %v137_v10  ;;  %v135_v12 = vmul.f32 1.442695, %v133_v11 }
  0xee   :  { %189 = vpow2.f32 %v135_v12 }
  0xf9   :  { %v188_v13 = vpop.eup %187 }
  0xfa   :  { %140 = vst [vmem:[#allocation7 + $0x8] sm:$0xff] %v188_v13 }
  0xfb   :  { %v190_v14 = vpop.eup %189 }
  0xfc   :  { %139 = vst [vmem:[#allocation7] sm:$0xff] %v190_v14 }
  0xfd   :  { %242 = shalt.err (!%p239_p0)
}
  0xfe   :  { %152 = dma.vmem_to_hbm [thread:$0]  %s147_s1, 256, %s299_s2, [#allocation4], %s258_s12, %s258_s12, %s259_s13  }
  0xff   :  { %255 = dma.done.wait [#allocation4], 256  }
 0x100   :  { %256 = vsyncadd [#allocation4], 4294967040 }
 0x101   :  { %156 = vsyncpa [#allocation3], 1 }
 0x102   :  { %157 = vsyncpa [#allocation6], 1 }
 0x103   :  { %158 = vsyncpa [#allocation4], 1 }

</bundles_post_ra>
